<compile_context>
chip_gen: v5e
topology: v5e:2x2
jax: 0.10.0
libtpu: 0.0.40
codegen_flags: <defaults>
</compile_context>

<pallas_src>
import functools

import jax
import jax.numpy as jnp
from jax import lax
from jax.experimental import pallas as pl
from jax.experimental.pallas import tpu as pltpu

EPS = 1e-5
TILE_M = 256  # rows of the flattened spatial axis per grid step


def _pick_tile(m, target=TILE_M):
    for t in (target, 128, 64, 32, 16, 8):
        if t <= m and m % t == 0:
            return t
    return m  # fall back to a single full-extent block


# ----------------------------- Pallas kernels -----------------------------

def _stage1_ds_kernel(x_ref, s1_ref, t1_ref, w1_ref, b2_ref, feat_ref, r_ref):
    # feat = relu(bn1(x));  r = relu(bn2(conv1(feat)))
    # bn2's scale is pre-folded into the columns of w1; b2 is bn2's shift.
    feat = jnp.maximum(x_ref[...] * s1_ref[...] + t1_ref[...], 0.0)     # f32 VPU
    feat_ref[...] = feat.astype(feat_ref.dtype)                          # needed for shortcut
    y = jnp.dot(feat.astype(w1_ref.dtype), w1_ref[...],
                preferred_element_type=jnp.float32)                      # MXU
    r_ref[...] = jnp.maximum(y + b2_ref[...], 0.0).astype(r_ref.dtype)   # f32 epilogue


def _stage1_id_kernel(x_ref, s1_ref, t1_ref, w1_ref, b2_ref, r_ref):
    # Same as above, but the identity-shortcut block never needs `feat` outside.
    feat = jnp.maximum(x_ref[...] * s1_ref[...] + t1_ref[...], 0.0)
    y = jnp.dot(feat.astype(w1_ref.dtype), w1_ref[...],
                preferred_element_type=jnp.float32)
    r_ref[...] = jnp.maximum(y + b2_ref[...], 0.0).astype(r_ref.dtype)


def _stage2_ds_kernel(p_ref, w2_ref, b3_ref, w3_ref, sc_ref, wd_ref, o_ref):
    # r2  = relu(bn3(conv2)) : one deep-K im2col matmul, bn3 scale folded into w2.
    # out = conv3(r2) + downsample(feat) : two MXU dots sharing the resident output tile.
    z = jnp.dot(p_ref[...], w2_ref[...], preferred_element_type=jnp.float32)
    r2 = jnp.maximum(z + b3_ref[...], 0.0)
    out = jnp.dot(r2.astype(w3_ref.dtype), w3_ref[...],
                  preferred_element_type=jnp.float32)
    out = out + jnp.dot(sc_ref[...], wd_ref[...],
                        preferred_element_type=jnp.float32)
    o_ref[...] = out.astype(o_ref.dtype)


def _stage2_id_kernel(p_ref, w2_ref, b3_ref, w3_ref, sc_ref, o_ref):
    # Identity shortcut: out = conv3(relu(bn3(conv2))) + x
    z = jnp.dot(p_ref[...], w2_ref[...], preferred_element_type=jnp.float32)
    r2 = jnp.maximum(z + b3_ref[...], 0.0)
    out = jnp.dot(r2.astype(w3_ref.dtype), w3_ref[...],
                  preferred_element_type=jnp.float32)
    o_ref[...] = (out + sc_ref[...].astype(jnp.float32)).astype(o_ref.dtype)


# --------------------------- pallas_call wrappers ---------------------------

def _stage1(x_flat, s1, t1, w1f, b2, act_dtype, with_feat):
    M, Cin = x_flat.shape
    Cm = w1f.shape[1]
    tm = _pick_tile(M)
    grid = (M // tm,)
    in_specs = [
        pl.BlockSpec((tm, Cin), lambda i: (i, 0)),     # x tile
        pl.BlockSpec((1, Cin), lambda i: (0, 0)),      # bn1 scale
        pl.BlockSpec((1, Cin), lambda i: (0, 0)),      # bn1 shift
        pl.BlockSpec((Cin, Cm), lambda i: (0, 0)),     # folded conv1 weight (resident)
        pl.BlockSpec((1, Cm), lambda i: (0, 0)),       # bn2 shift
    ]
    r_spec = pl.BlockSpec((tm, Cm), lambda i: (i, 0))
    if with_feat:
        kernel = _stage1_ds_kernel
        out_shape = (jax.ShapeDtypeStruct((M, Cin), act_dtype),
                     jax.ShapeDtypeStruct((M, Cm), act_dtype))
        out_specs = (pl.BlockSpec((tm, Cin), lambda i: (i, 0)), r_spec)
    else:
        kernel = _stage1_id_kernel
        out_shape = jax.ShapeDtypeStruct((M, Cm), act_dtype)
        out_specs = r_spec
    return pl.pallas_call(
        kernel,
        out_shape=out_shape,
        grid=grid,
        in_specs=in_specs,
        out_specs=out_specs,
        compiler_params=pltpu.CompilerParams(dimension_semantics=("parallel",)),
    )(x_flat, s1.reshape(1, Cin), t1.reshape(1, Cin), w1f, b2.reshape(1, Cm))


def _stage2(patches, w2f, b3, w3t, shortcut, wdt):
    M, K2 = patches.shape
    Cm = w2f.shape[1]
    Cout = w3t.shape[1]
    tm = _pick_tile(M)
    grid = (M // tm,)
    base_specs = [
        pl.BlockSpec((tm, K2), lambda i: (i, 0)),      # im2col patch tile
        pl.BlockSpec((K2, Cm), lambda i: (0, 0)),      # folded conv2 weight (resident)
        pl.BlockSpec((1, Cm), lambda i: (0, 0)),       # bn3 shift
        pl.BlockSpec((Cm, Cout), lambda i: (0, 0)),    # conv3 weight (resident)
    ]
    o_spec = pl.BlockSpec((tm, Cout), lambda i: (i, 0))
    cparams = pltpu.CompilerParams(dimension_semantics=("parallel",))
    if wdt is not None:
        Cin = wdt.shape[0]
        in_specs = base_specs + [
            pl.BlockSpec((tm, Cin), lambda i: (i, 0)),     # strided feat tile
            pl.BlockSpec((Cin, Cout), lambda i: (0, 0)),   # downsample weight (resident)
        ]
        return pl.pallas_call(
            _stage2_ds_kernel,
            out_shape=jax.ShapeDtypeStruct((M, Cout), jnp.float32),
            grid=grid,
            in_specs=in_specs,
            out_specs=o_spec,
            compiler_params=cparams,
        )(patches, w2f, b3.reshape(1, Cm), w3t, shortcut, wdt)
    else:
        in_specs = base_specs + [pl.BlockSpec((tm, Cout), lambda i: (i, 0))]
        return pl.pallas_call(
            _stage2_id_kernel,
            out_shape=jax.ShapeDtypeStruct((M, Cout), jnp.float32),
            grid=grid,
            in_specs=in_specs,
            out_specs=o_spec,
            compiler_params=cparams,
        )(patches, w2f, b3.reshape(1, Cm), w3t, shortcut)


# ------------------------------- module glue -------------------------------

def _bn_scale_shift(bn):
    scale = bn['g'] / jnp.sqrt(bn['v'] + EPS)
    shift = bn['b'] - bn['m'] * scale
    return scale, shift


def _im2col_3x3(x_nhwc, stride):
    """Strided 3x3 patch extraction (pad=1). Exact stride -> no wasted conv output."""
    N, H, W, C = x_nhwc.shape
    xp = jnp.pad(x_nhwc, ((0, 0), (1, 1), (1, 1), (0, 0)))
    Ho = (H - 1) // stride + 1
    Wo = (W - 1) // stride + 1
    cols = []
    for dy in range(3):
        for dx in range(3):
            cols.append(lax.slice(
                xp,
                (0, dy, dx, 0),
                (N, dy + (Ho - 1) * stride + 1, dx + (Wo - 1) * stride + 1, C),
                (1, stride, stride, 1)))
    patches = jnp.concatenate(cols, axis=-1)          # (N, Ho, Wo, 9C)
    return patches.reshape(N * Ho * Wo, 9 * C), Ho, Wo


@functools.partial(jax.jit, static_argnames=("stride", "mxu_dtype"))
def bottleneck_forward(x_nchw, p, *, stride, mxu_dtype=jnp.bfloat16):
    N, Cin, H, W = x_nchw.shape
    Cout = p['w3'].shape[0]
    Cm = p['w1'].shape[0]
    has_ds = p['wd'] is not None

    x = jnp.transpose(x_nchw, (0, 2, 3, 1)).astype(jnp.float32)        # -> NHWC
    x_flat = x.reshape(N * H * W, Cin)

    # Fold eval-mode BN affines into the adjacent convs (scale into weight columns,
    # shift kept as a per-channel bias applied in-kernel before ReLU).
    s1, t1 = _bn_scale_shift(p['bn1'])
    s2, t2 = _bn_scale_shift(p['bn2'])
    s3, t3 = _bn_scale_shift(p['bn3'])

    w1f = (jnp.transpose(p['w1'][:, :, 0, 0]) * s2[None, :]).astype(mxu_dtype)       # (Cin, Cm)
    w2f = (jnp.transpose(p['w2'], (2, 3, 1, 0)).reshape(9 * Cm, Cm)
           * s3[None, :]).astype(mxu_dtype)                                            # (9Cm, Cm)
    w3t = jnp.transpose(p['w3'][:, :, 0, 0]).astype(mxu_dtype)                         # (Cm, Cout)
    wdt = jnp.transpose(p['wd'][:, :, 0, 0]).astype(mxu_dtype) if has_ds else None     # (Cin, Cout)

    # Stage 1: bn1 + relu -> conv1 -> bn2(affine) + relu   (tiled over rows)
    if has_ds:
        feat, r1 = _stage1(x_flat, s1, t1, w1f, t2, mxu_dtype, with_feat=True)
    else:
        r1 = _stage1(x_flat, s1, t1, w1f, t2, mxu_dtype, with_feat=False)

    # im2col for the strided 3x3 conv (XLA glue, fused under jit).
    patches, Ho, Wo = _im2col_3x3(r1.reshape(N, H, W, Cm), stride)

    # Shortcut operand.
    if has_ds:
        feat_sub = feat.reshape(N, H, W, Cin)[:, ::stride, ::stride, :]
        shortcut = feat_sub.reshape(N * Ho * Wo, Cin)
    else:
        shortcut = x_flat                       # Cin == Cout, stride == 1

    # Stage 2: conv2(im2col) + bn3 + relu + conv3 + shortcut  (fully fused, tiled over rows)
    out = _stage2(patches, w2f, t3, w3t, shortcut, wdt)
    out = out.reshape(N, Ho, Wo, Cout)
    return jnp.transpose(out, (0, 3, 1, 2))     # -> NCHW


def init_params(key, in_chan, out_chan, stride):
    mid = out_chan // 4
    keys = jax.random.split(key, 8)

    def kaiming(k, shape):  # OIHW, kaiming_normal fan_out, gain=sqrt(2)
        fan_out = shape[0] * shape[2] * shape[3]
        return jax.random.normal(k, shape, jnp.float32) * jnp.sqrt(2.0 / fan_out)

    def bn_params(k, c):
        k1, k2, k3, k4 = jax.random.split(k, 4)
        return dict(g=jax.random.uniform(k1, (c,), jnp.float32, 0.5, 1.5),
                    b=jax.random.normal(k2, (c,), jnp.float32) * 0.1,
                    m=jax.random.normal(k3, (c,), jnp.float32) * 0.1,
                    v=jax.random.uniform(k4, (c,), jnp.float32, 0.5, 1.5))

    p = dict(
        bn1=bn_params(keys[0], in_chan),
        w1=kaiming(keys[1], (mid, in_chan, 1, 1)),
        bn2=bn_params(keys[2], mid),
        w2=kaiming(keys[3], (mid, mid, 3, 3)),
        bn3=bn_params(keys[4], mid),
        w3=kaiming(keys[5], (out_chan, mid, 1, 1)),
        wd=None,
    )
    if in_chan != out_chan or stride != 1:
        p['wd'] = kaiming(keys[6], (out_chan, in_chan, 1, 1))
    return p


# --------------------------- pure-JAX reference ---------------------------

def _torch_conv(x, w, stride=1, padding=0):
    return lax.conv_general_dilated(
        x, w, (stride, stride), [(padding, padding), (padding, padding)],
        dimension_numbers=('NCHW', 'OIHW', 'NCHW'))


def ref_forward(x, p, stride):
    def bn(z, q):
        sc = q['g'] / jnp.sqrt(q['v'] + EPS)
        sh = q['b'] - q['m'] * sc
        return z * sc[None, :, None, None] + sh[None, :, None, None]
    feat = jax.nn.relu(bn(x, p['bn1']))
    r = _torch_conv(feat, p['w1'])
    r = jax.nn.relu(bn(r, p['bn2']))
    r = _torch_conv(r, p['w2'], stride=stride, padding=1)
    r = jax.nn.relu(bn(r, p['bn3']))
    r = _torch_conv(r, p['w3'])
    sc = _torch_conv(feat, p['wd'], stride=stride) if p['wd'] is not None else x
    return sc + r


# ----------------------------------- main -----------------------------------

if __name__ == "__main__":
    key = jax.random.PRNGKey(0)
    kx, kp1, kp2 = jax.random.split(key, 3)

    # Config A: channel expansion + stride-2 (downsample path active)
    N, Cin, H, W = 2, 8, 16, 16
    Cout, stride = 32, 2
    x = jax.random.normal(kx, (N, Cin, H, W), jnp.float32)
    p = init_params(kp1, Cin, Cout, stride)
    ref = ref_forward(x, p, stride)

    # f32 MXU path: tight correctness check against the XLA reference.
    out_f32 = jax.block_until_ready(
        bottleneck_forward(x, p, stride=stride, mxu_dtype=jnp.float32))
    assert out_f32.shape == ref.shape, (out_f32.shape, ref.shape)
    assert jnp.allclose(out_f32, ref, rtol=5e-4, atol=5e-4), \
        float(jnp.max(jnp.abs(out_f32 - ref)))

    # bf16 MXU path (default, perf mode on v6e/v7x): loose sanity check.
    out_bf16 = jax.block_until_ready(
        bottleneck_forward(x, p, stride=stride, mxu_dtype=jnp.bfloat16))
    assert out_bf16.shape == ref.shape
    assert jnp.allclose(out_bf16, ref, rtol=1e-1, atol=1e-1), \
        float(jnp.max(jnp.abs(out_bf16 - ref)))

    # Config B: identity shortcut (no downsample, stride=1, Cin == Cout)
    Cin2 = Cout2 = 16
    stride2 = 1
    x2 = jax.random.normal(kx, (N, Cin2, H, W), jnp.float32)
    p2 = init_params(kp2, Cin2, Cout2, stride2)
    ref2 = ref_forward(x2, p2, stride2)
    out2 = jax.block_until_ready(
        bottleneck_forward(x2, p2, stride=stride2, mxu_dtype=jnp.float32))
    assert out2.shape == ref2.shape
    assert jnp.allclose(out2, ref2, rtol=5e-4, atol=5e-4), \
        float(jnp.max(jnp.abs(out2 - ref2)))

    print("KERNEL_OK")
</pallas_src>

<mosaic_0001>
module attributes {stable_mosaic.version = 11 : i64} {
  func.func @_stage1_ds_kernel(%arg0: i32, %arg1: memref<256x8xf32, #tpu.memory_space<vmem>>, %arg2: memref<1x8xf32, #tpu.memory_space<vmem>>, %arg3: memref<1x8xf32, #tpu.memory_space<vmem>>, %arg4: memref<8x8xf32, #tpu.memory_space<vmem>>, %arg5: memref<1x8xf32, #tpu.memory_space<vmem>>, %arg6: memref<256x8xf32, #tpu.memory_space<vmem>>, %arg7: memref<256x8xf32, #tpu.memory_space<vmem>>) attributes {dimension_semantics = [#tpu.dimension_semantics<parallel>], iteration_bounds = array<i64: 2>, scalar_prefetch = 0 : i64, scratch_operands = 0 : i64, tpu.core_type = #tpu.core_type<tc>, window_params = [{transform_indices = @transform_0, window_bounds = array<i64: 256, 8>}, {pipeline_mode = #tpu.pipeline_mode<synchronous>, transform_indices = @transform_1, window_bounds = array<i64: 1, 8>}, {pipeline_mode = #tpu.pipeline_mode<synchronous>, transform_indices = @transform_2, window_bounds = array<i64: 1, 8>}, {pipeline_mode = #tpu.pipeline_mode<synchronous>, transform_indices = @transform_3, window_bounds = array<i64: 8, 8>}, {pipeline_mode = #tpu.pipeline_mode<synchronous>, transform_indices = @transform_4, window_bounds = array<i64: 1, 8>}, {transform_indices = @transform_5, window_bounds = array<i64: 256, 8>}, {transform_indices = @transform_6, window_bounds = array<i64: 256, 8>}]} {
    %c0 = arith.constant 0 : index
    %c0_0 = arith.constant 0 : index
    %0 = vector.load %arg1[%c0, %c0_0] : memref<256x8xf32, #tpu.memory_space<vmem>>, vector<256x8xf32>
    %c0_1 = arith.constant 0 : index
    %c0_2 = arith.constant 0 : index
    %1 = vector.load %arg2[%c0_1, %c0_2] : memref<1x8xf32, #tpu.memory_space<vmem>>, vector<1x8xf32>
    %2 = vector.broadcast %1 : vector<1x8xf32> to vector<256x8xf32>
    %3 = arith.mulf %0, %2 : vector<256x8xf32>
    %c0_3 = arith.constant 0 : index
    %c0_4 = arith.constant 0 : index
    %4 = vector.load %arg3[%c0_3, %c0_4] : memref<1x8xf32, #tpu.memory_space<vmem>>, vector<1x8xf32>
    %5 = vector.broadcast %4 : vector<1x8xf32> to vector<256x8xf32>
    %6 = arith.addf %3, %5 : vector<256x8xf32>
    %cst = arith.constant 0.000000e+00 : f32
    %7 = vector.broadcast %cst : f32 to vector<256x8xf32>
    %8 = arith.maximumf %6, %7 : vector<256x8xf32>
    %c0_5 = arith.constant 0 : index
    %c0_6 = arith.constant 0 : index
    %9 = vector.load %arg6[%c0_5, %c0_6] : memref<256x8xf32, #tpu.memory_space<vmem>>, vector<256x8xf32>
    tpu.vector_store %arg6[%c0_5, %c0_6], %8 {strides = array<i32>} : memref<256x8xf32, #tpu.memory_space<vmem>>, vector<256x8xf32>,
    %c0_7 = arith.constant 0 : index
    %c0_8 = arith.constant 0 : index
    %10 = vector.load %arg4[%c0_7, %c0_8] : memref<8x8xf32, #tpu.memory_space<vmem>>, vector<8x8xf32>
    %cst_9 = arith.constant dense<0.000000e+00> : vector<256x8xf32>
    %11 = tpu.matmul %8, %10, %cst_9 {dimension_numbers = #tpu.dot_dimension_numbers<[1], [0], [0], [1], [0, 0, 1, 1], [], []>} : vector<256x8xf32>, vector<8x8xf32>, vector<256x8xf32> -> vector<256x8xf32>
    %c0_10 = arith.constant 0 : index
    %c0_11 = arith.constant 0 : index
    %12 = vector.load %arg5[%c0_10, %c0_11] : memref<1x8xf32, #tpu.memory_space<vmem>>, vector<1x8xf32>
    %13 = vector.broadcast %12 : vector<1x8xf32> to vector<256x8xf32>
    %14 = arith.addf %11, %13 : vector<256x8xf32>
    %cst_12 = arith.constant 0.000000e+00 : f32
    %15 = vector.broadcast %cst_12 : f32 to vector<256x8xf32>
    %16 = arith.maximumf %14, %15 : vector<256x8xf32>
    %c0_13 = arith.constant 0 : index
    %c0_14 = arith.constant 0 : index
    %17 = vector.load %arg7[%c0_13, %c0_14] : memref<256x8xf32, #tpu.memory_space<vmem>>, vector<256x8xf32>
    tpu.vector_store %arg7[%c0_13, %c0_14], %16 {strides = array<i32>} : memref<256x8xf32, #tpu.memory_space<vmem>>, vector<256x8xf32>,
    return
  }
  func.func @transform_0(%arg0: i32) -> (i32, i32) {
    %c0_i32 = arith.constant 0 : i32
    %c0_i32_0 = arith.constant 0 : i32
    return %arg0, %c0_i32 : i32, i32
  }
  func.func @transform_1(%arg0: i32) -> (i32, i32) {
    %c0_i32 = arith.constant 0 : i32
    %c0_i32_0 = arith.constant 0 : i32
    %c0_i32_1 = arith.constant 0 : i32
    return %c0_i32, %c0_i32_0 : i32, i32
  }
  func.func @transform_2(%arg0: i32) -> (i32, i32) {
    %c0_i32 = arith.constant 0 : i32
    %c0_i32_0 = arith.constant 0 : i32
    %c0_i32_1 = arith.constant 0 : i32
    return %c0_i32, %c0_i32_0 : i32, i32
  }
  func.func @transform_3(%arg0: i32) -> (i32, i32) {
    %c0_i32 = arith.constant 0 : i32
    %c0_i32_0 = arith.constant 0 : i32
    %c0_i32_1 = arith.constant 0 : i32
    return %c0_i32, %c0_i32_0 : i32, i32
  }
  func.func @transform_4(%arg0: i32) -> (i32, i32) {
    %c0_i32 = arith.constant 0 : i32
    %c0_i32_0 = arith.constant 0 : i32
    %c0_i32_1 = arith.constant 0 : i32
    return %c0_i32, %c0_i32_0 : i32, i32
  }
  func.func @transform_5(%arg0: i32) -> (i32, i32) {
    %c0_i32 = arith.constant 0 : i32
    %c0_i32_0 = arith.constant 0 : i32
    return %arg0, %c0_i32 : i32, i32
  }
  func.func @transform_6(%arg0: i32) -> (i32, i32) {
    %c0_i32 = arith.constant 0 : i32
    %c0_i32_0 = arith.constant 0 : i32
    return %arg0, %c0_i32 : i32, i32
  }
}

module attributes {stable_mosaic.version = 11 : i64} {
  func.func @_stage2_ds_kernel(%arg0: i32, %arg1: memref<128x72xf32, #tpu.memory_space<vmem>>, %arg2: memref<72x8xf32, #tpu.memory_space<vmem>>, %arg3: memref<1x8xf32, #tpu.memory_space<vmem>>, %arg4: memref<8x32xf32, #tpu.memory_space<vmem>>, %arg5: memref<128x8xf32, #tpu.memory_space<vmem>>, %arg6: memref<8x32xf32, #tpu.memory_space<vmem>>, %arg7: memref<128x32xf32, #tpu.memory_space<vmem>>) attributes {dimension_semantics = [#tpu.dimension_semantics<parallel>], iteration_bounds = array<i64: 1>, scalar_prefetch = 0 : i64, scratch_operands = 0 : i64, tpu.core_type = #tpu.core_type<tc>, window_params = [{transform_indices = @transform_0, window_bounds = array<i64: 128, 72>}, {pipeline_mode = #tpu.pipeline_mode<synchronous>, transform_indices = @transform_1, window_bounds = array<i64: 72, 8>}, {pipeline_mode = #tpu.pipeline_mode<synchronous>, transform_indices = @transform_2, window_bounds = array<i64: 1, 8>}, {pipeline_mode = #tpu.pipeline_mode<synchronous>, transform_indices = @transform_3, window_bounds = array<i64: 8, 32>}, {transform_indices = @transform_4, window_bounds = array<i64: 128, 8>}, {pipeline_mode = #tpu.pipeline_mode<synchronous>, transform_indices = @transform_5, window_bounds = array<i64: 8, 32>}, {transform_indices = @transform_6, window_bounds = array<i64: 128, 32>}]} {
    %c0 = arith.constant 0 : index
    %c0_0 = arith.constant 0 : index
    %0 = vector.load %arg1[%c0, %c0_0] : memref<128x72xf32, #tpu.memory_space<vmem>>, vector<128x72xf32>
    %c0_1 = arith.constant 0 : index
    %c0_2 = arith.constant 0 : index
    %1 = vector.load %arg2[%c0_1, %c0_2] : memref<72x8xf32, #tpu.memory_space<vmem>>, vector<72x8xf32>
    %cst = arith.constant dense<0.000000e+00> : vector<128x8xf32>
    %2 = tpu.matmul %0, %1, %cst {dimension_numbers = #tpu.dot_dimension_numbers<[1], [0], [0], [1], [0, 0, 1, 1], [], []>} : vector<128x72xf32>, vector<72x8xf32>, vector<128x8xf32> -> vector<128x8xf32>
    %c0_3 = arith.constant 0 : index
    %c0_4 = arith.constant 0 : index
    %3 = vector.load %arg3[%c0_3, %c0_4] : memref<1x8xf32, #tpu.memory_space<vmem>>, vector<1x8xf32>
    %4 = vector.broadcast %3 : vector<1x8xf32> to vector<128x8xf32>
    %5 = arith.addf %2, %4 : vector<128x8xf32>
    %cst_5 = arith.constant 0.000000e+00 : f32
    %6 = vector.broadcast %cst_5 : f32 to vector<128x8xf32>
    %7 = arith.maximumf %5, %6 : vector<128x8xf32>
    %c0_6 = arith.constant 0 : index
    %c0_7 = arith.constant 0 : index
    %8 = vector.load %arg4[%c0_6, %c0_7] : memref<8x32xf32, #tpu.memory_space<vmem>>, vector<8x32xf32>
    %cst_8 = arith.constant dense<0.000000e+00> : vector<128x32xf32>
    %9 = tpu.matmul %7, %8, %cst_8 {dimension_numbers = #tpu.dot_dimension_numbers<[1], [0], [0], [1], [0, 0, 1, 1], [], []>} : vector<128x8xf32>, vector<8x32xf32>, vector<128x32xf32> -> vector<128x32xf32>
    %c0_9 = arith.constant 0 : index
    %c0_10 = arith.constant 0 : index
    %10 = vector.load %arg5[%c0_9, %c0_10] : memref<128x8xf32, #tpu.memory_space<vmem>>, vector<128x8xf32>
    %c0_11 = arith.constant 0 : index
    %c0_12 = arith.constant 0 : index
    %11 = vector.load %arg6[%c0_11, %c0_12] : memref<8x32xf32, #tpu.memory_space<vmem>>, vector<8x32xf32>
    %cst_13 = arith.constant dense<0.000000e+00> : vector<128x32xf32>
    %12 = tpu.matmul %10, %11, %cst_13 {dimension_numbers = #tpu.dot_dimension_numbers<[1], [0], [0], [1], [0, 0, 1, 1], [], []>} : vector<128x8xf32>, vector<8x32xf32>, vector<128x32xf32> -> vector<128x32xf32>
    %13 = arith.addf %9, %12 : vector<128x32xf32>
    %c0_14 = arith.constant 0 : index
    %c0_15 = arith.constant 0 : index
    %14 = vector.load %arg7[%c0_14, %c0_15] : memref<128x32xf32, #tpu.memory_space<vmem>>, vector<128x32xf32>
    tpu.vector_store %arg7[%c0_14, %c0_15], %13 {strides = array<i32>} : memref<128x32xf32, #tpu.memory_space<vmem>>, vector<128x32xf32>,
    return
  }
  func.func @transform_0(%arg0: i32) -> (i32, i32) {
    %c0_i32 = arith.constant 0 : i32
    %c0_i32_0 = arith.constant 0 : i32
    return %arg0, %c0_i32 : i32, i32
  }
  func.func @transform_1(%arg0: i32) -> (i32, i32) {
    %c0_i32 = arith.constant 0 : i32
    %c0_i32_0 = arith.constant 0 : i32
    %c0_i32_1 = arith.constant 0 : i32
    return %c0_i32, %c0_i32_0 : i32, i32
  }
  func.func @transform_2(%arg0: i32) -> (i32, i32) {
    %c0_i32 = arith.constant 0 : i32
    %c0_i32_0 = arith.constant 0 : i32
    %c0_i32_1 = arith.constant 0 : i32
    return %c0_i32, %c0_i32_0 : i32, i32
  }
  func.func @transform_3(%arg0: i32) -> (i32, i32) {
    %c0_i32 = arith.constant 0 : i32
    %c0_i32_0 = arith.constant 0 : i32
    %c0_i32_1 = arith.constant 0 : i32
    return %c0_i32, %c0_i32_0 : i32, i32
  }
  func.func @transform_4(%arg0: i32) -> (i32, i32) {
    %c0_i32 = arith.constant 0 : i32
    %c0_i32_0 = arith.constant 0 : i32
    return %arg0, %c0_i32 : i32, i32
  }
  func.func @transform_5(%arg0: i32) -> (i32, i32) {
    %c0_i32 = arith.constant 0 : i32
    %c0_i32_0 = arith.constant 0 : i32
    %c0_i32_1 = arith.constant 0 : i32
    return %c0_i32, %c0_i32_0 : i32, i32
  }
  func.func @transform_6(%arg0: i32) -> (i32, i32) {
    %c0_i32 = arith.constant 0 : i32
    %c0_i32_0 = arith.constant 0 : i32
    return %arg0, %c0_i32 : i32, i32
  }
}

</mosaic_0001>

<bundles_post_ra>
// kernel: bottleneck_forward.2
= control target key start
LH: loop header
LB: loop body
LE: loop exit
PB: predicated region body
PF: predicated region fallthrough
CT: control target
= control target key end

     0   :  { %s908_s21 = smov 0   ;;  %s1299_s0 = inlined_call_operand.vmem [shape: f32[512,8], index: 0, kind: input, shape index: {}]   ;;  %s1300_s1 = inlined_call_operand.vmem [shape: f32[1,8], index: 1, kind: input, shape index: {}]   ;;  %s1301_s2 = inlined_call_operand.vmem [shape: f32[1,8], index: 2, kind: input, shape index: {}]   ;;  %s1302_s3 = inlined_call_operand.vmem [shape: f32[8,8], index: 3, kind: input, shape index: {}]   ;;  %s1303_s4 = inlined_call_operand.vmem [shape: f32[1,8], index: 4, kind: input, shape index: {}]   ;;  %s1304_s5 = inlined_call_operand.vmem [shape: f32[512,8], index: 5, kind: output, shape index: {0}]   ;;  %s1305_s6 = inlined_call_operand.vmem [shape: f32[512,8], index: 6, kind: output, shape index: {1}]  }
   0x1 LB: > { %s806_s22 = sadd.s32 4294967295, %s871_s21   ;;  %p810_p0 = scmp.ge.s32.totalorder %s871_s21, 1  ;;  %s871_s21 = sphi %s908_s21, %s17_s21  }
   0x2   : > { %p216_p1 = scmp.lt.s32.totalorder %s871_s21, 3 }
   0x4   : > { %p217_p2 = pnand %p810_p0, %p216_p1 }
   0x5   : > { %s811_s25 = sshll.u32 (!%p217_p2), %s806_s22, 5 }
   0x6   : > { %220 = sbr.rel (%p217_p2) target bundleno = 215 (0xd7), region = 40  ;;  %p252_p3 = scmp.lt.s32.totalorder (!%p217_p2), %s811_s25, 63 }
   0xb   : > { %v438_v0 = vld [vmem:[%s1302_s3] sm:$0xff]  ;;  %s1307_s25 = smov (!%p252_p3, %s811_s25), 63  ;;  %vm405_vm0 = vcmask 64512  }
   0xc   : > { %852 = vmatpush.msra.mxu2 %v438_v0  ;;  %853 = vmatpush.msra.mxu3 %v438_v0  ;;  %v922_v1 = vld [vmem:[%s1300_s1] ss:$0 sm:$0xff]  ;;  %s924_s28 = sshll.u32 %s1307_s25, 3 }
   0xd   : > { %554 = vmatpush.msra.mxu0 %v438_v0  ;;  %851 = vmatpush.msra.mxu1 %v438_v0  ;;  %s930_s7 = scalar_lea.vmem %s1299_s0, %s924_s28  ;;  %v935_v2 = vld [vmem:[%s1301_s2] ss:$0 sm:$0xff]  ;;  %s959_s12 = scalar_lea.vmem %s1304_s5, %s924_s28 }
   0xe   : > { %v285_v3 = vld [vmem:[%s930_s7 + $0x80] sm:$0xff]  ;;  %v286_v10 = vld [vmem:[%s930_s7 + $0x88] sm:$0xff]  ;;  %v287_v23 = vld [vmem:[%s930_s7 + $0x90] sm:$0xff]  ;;  %s1200_s17 = scalar_lea.vmem %s1305_s6, %s924_s28 }
   0xf   : > { %v293_v4 = vld [vmem:[%s930_s7 + $0xc0] sm:$0xff]  ;;  %v321_v6 = vmul.f32 %v922_v1, %v285_v3  ;;  %v294_v11 = vld [vmem:[%s930_s7 + $0xc8] sm:$0xff]  ;;  %v322_v13 = vmul.f32 %v922_v1, %v286_v10  ;;  %v295_v24 = vld [vmem:[%s930_s7 + $0xd0] sm:$0xff]  ;;  %v323_v35 = vmul.f32 %v922_v1, %v287_v23 }
  0x10   : > { %v269_v5 = vld [vmem:[%s930_s7] sm:$0xff]  ;;  %v329_v7 = vmul.f32 %v922_v1, %v293_v4  ;;  %v330_v14 = vmul.f32 %v922_v1, %v294_v11  ;;  %v270_v15 = vld [vmem:[%s930_s7 + $0x8] sm:$0xff]  ;;  %v271_v29 = vld [vmem:[%s930_s7 + $0x10] sm:$0xff]  ;;  %v331_v36 = vmul.f32 %v922_v1, %v295_v24 }
  0x11   : > { %v305_v8 = vmul.f32 %v922_v1, %v269_v5  ;;  %v277_v9 = vld [vmem:[%s930_s7 + $0x40] sm:$0xff]  ;;  %v278_v16 = vld [vmem:[%s930_s7 + $0x48] sm:$0xff]  ;;  %v357_v17 = vadd.f32 %v935_v2, %v321_v6  ;;  %v306_v20 = vmul.f32 %v922_v1, %v270_v15  ;;  %v358_v28 = vadd.f32 %v935_v2, %v322_v13  ;;  %v279_v30 = vld [vmem:[%s930_s7 + $0x50] sm:$0xff] }
  0x12   : > { %v313_v12 = vmul.f32 %v922_v1, %v277_v9  ;;  %v365_v18 = vadd.f32 %v935_v2, %v329_v7  ;;  %v314_v22 = vmul.f32 %v922_v1, %v278_v16  ;;  %v366_v32 = vadd.f32 %v935_v2, %v330_v14  ;;  %v288_v33 = vld [vmem:[%s930_s7 + $0x98] sm:$0xff]  ;;  %v289_v49 = vld [vmem:[%s930_s7 + $0xa0] sm:$0xff]  ;;  %v290_v3 = vld [vmem:[%s930_s7 + $0xa8] sm:$0xff] }
  0x13   : > { %v341_v19 = vadd.f32 %v935_v2, %v305_v8  ;;  %v389_v25 = vmax.f32 %v357_v17, 0.0  ;;  %v342_v34 = vadd.f32 %v935_v2, %v306_v20  ;;  %v296_v37 = vld [vmem:[%s930_s7 + $0xd8] sm:$0xff]  ;;  %v307_v39 = vmul.f32 %v922_v1, %v271_v29  ;;  %v297_v53 = vld [vmem:[%s930_s7 + $0xe0] sm:$0xff]  ;;  %v298_v7 = vld [vmem:[%s930_s7 + $0xe8] sm:$0xff] }
  0x14   : > { %v349_v21 = vadd.f32 %v935_v2, %v313_v12  ;;  %v397_v26 = vmax.f32 %v365_v18, 0.0  ;;  %v350_v38 = vadd.f32 %v935_v2, %v314_v22  ;;  %v315_v40 = vmul.f32 %v922_v1, %v279_v30  ;;  %v272_v41 = vld [vmem:[%s930_s7 + $0x18] sm:$0xff]  ;;  %v273_v57 = vld [vmem:[%s930_s7 + $0x20] sm:$0xff]  ;;  %v274_v11 = vld [vmem:[%s930_s7 + $0x28] sm:$0xff] }
  0x15   : > { %v373_v27 = vmax.f32 %v341_v19, 0.0  ;;  %422 = vst.msk [vmem:[%s959_s12 + $0x80] sm:$0xff] %vm405_vm0, %v389_v25  ;;  %833 = vmatmul.msk.f32.vlgmr.msra.gmra.mxu2 %vm405_vm0, %v389_v25  ;;  %v390_v42 = vmax.f32 %v358_v28, 0.0  ;;  %v989_v43 = vadd.f32 %v935_v2, %v323_v35  ;;  %v324_v44 = vmul.f32 %v922_v1, %v288_v33  ;;  %v280_v45 = vld [vmem:[%s930_s7 + $0x58] sm:$0xff]  ;;  %v281_v61 = vld [vmem:[%s930_s7 + $0x60] sm:$0xff]  ;;  %v282_v15 = vld [vmem:[%s930_s7 + $0x68] sm:$0xff] }
  0x16   : > { %v381_v31 = vmax.f32 %v349_v21, 0.0  ;;  %841 = vmatmul.msk.f32.vlgmr.msra.gmra.mxu3 %vm405_vm0, %v397_v26  ;;  %430 = vst.msk [vmem:[%s959_s12 + $0xc0] sm:$0xff] %vm405_vm0, %v397_v26  ;;  %v398_v46 = vmax.f32 %v366_v32, 0.0  ;;  %v996_v47 = vadd.f32 %v935_v2, %v331_v36  ;;  %v332_v48 = vmul.f32 %v922_v1, %v296_v37  ;;  %v291_v19 = vld [vmem:[%s930_s7 + $0xb0] sm:$0xff] }
  0x17   : > { %817 = vmatmul.msk.f32.vlgmr.msra.gmra.mxu0 %vm405_vm0, %v373_v27  ;;  %406 = vst.msk [vmem:[%s959_s12] sm:$0xff] %vm405_vm0, %v373_v27  ;;  %v374_v50 = vmax.f32 %v342_v34, 0.0  ;;  %v1003_v51 = vadd.f32 %v935_v2, %v307_v39  ;;  %v308_v52 = vmul.f32 %v922_v1, %v272_v41  ;;  %v382_v54 = vmax.f32 %v350_v38, 0.0  ;;  %v299_v23 = vld [vmem:[%s930_s7 + $0xf0] sm:$0xff]  ;;  %v292_v41 = vld [vmem:[%s930_s7 + $0xb8] sm:$0xff] }
  0x18   : > { %825 = vmatmul.msk.f32.vlgmr.msra.gmra.mxu1 %vm405_vm0, %v381_v31  ;;  %414 = vst.msk [vmem:[%s959_s12 + $0x40] sm:$0xff] %vm405_vm0, %v381_v31  ;;  %v1010_v55 = vadd.f32 %v935_v2, %v315_v40  ;;  %v316_v56 = vmul.f32 %v922_v1, %v280_v45  ;;  %v391_v58 = vmax.f32 %v989_v43, 0.0  ;;  %v1018_v59 = vadd.f32 %v935_v2, %v324_v44  ;;  %v275_v33 = vld [vmem:[%s930_s7 + $0x30] sm:$0xff] }
  0x19   : > { %423 = vst.msk [vmem:[%s959_s12 + $0x88] sm:$0xff] %vm405_vm0, %v390_v42  ;;  %v325_v60 = vmul.f32 %v922_v1, %v289_v49  ;;  %v399_v62 = vmax.f32 %v996_v47, 0.0  ;;  %v1026_v63 = vadd.f32 %v935_v2, %v332_v48  ;;  %v333_v0 = vmul.f32 %v922_v1, %v297_v53  ;;  %v283_v34 = vld [vmem:[%s930_s7 + $0x70] sm:$0xff] }
  0x1a   : > { %431 = vst.msk [vmem:[%s959_s12 + $0xc8] sm:$0xff] %vm405_vm0, %v398_v46  ;;  %v375_v4 = vmax.f32 %v1003_v51, 0.0  ;;  %v1036_v5 = vadd.f32 %v935_v2, %v308_v52  ;;  %v309_v6 = vmul.f32 %v922_v1, %v273_v57  ;;  %v383_v8 = vmax.f32 %v1010_v55, 0.0  ;;  %v276_v57 = vld [vmem:[%s930_s7 + $0x38] sm:$0xff] }
  0x1b   : > { %407 = vst.msk [vmem:[%s959_s12 + $0x8] sm:$0xff] %vm405_vm0, %v374_v50  ;;  %v1046_v9 = vadd.f32 %v935_v2, %v316_v56  ;;  %v317_v10 = vmul.f32 %v922_v1, %v281_v61  ;;  %v392_v12 = vmax.f32 %v1018_v59, 0.0  ;;  %v1054_v13 = vadd.f32 %v935_v2, %v325_v60 }
  0x1c   : > { %415 = vst.msk [vmem:[%s959_s12 + $0x48] sm:$0xff] %vm405_vm0, %v382_v54  ;;  %v326_v14 = vmul.f32 %v922_v1, %v290_v3  ;;  %v400_v16 = vmax.f32 %v1026_v63, 0.0  ;;  %v1062_v17 = vadd.f32 %v935_v2, %v333_v0  ;;  %v334_v18 = vmul.f32 %v922_v1, %v298_v7 }
  0x1d   : > { %834 = vmatmul.msk.f32.gmra.mxu2 %vm405_vm0, %v390_v42  ;;  %424 = vst.msk [vmem:[%s959_s12 + $0x90] sm:$0xff] %vm405_vm0, %v391_v58  ;;  %v376_v20 = vmax.f32 %v1036_v5, 0.0  ;;  %v1072_v21 = vadd.f32 %v935_v2, %v309_v6  ;;  %v310_v22 = vmul.f32 %v922_v1, %v274_v11  ;;  %v384_v24 = vmax.f32 %v1046_v9, 0.0  ;;  %v300_v42 = vld [vmem:[%s930_s7 + $0xf8] sm:$0xff] }
  0x1e   : > { %842 = vmatmul.msk.f32.gmra.mxu3 %vm405_vm0, %v398_v46  ;;  %432 = vst.msk [vmem:[%s959_s12 + $0xd0] sm:$0xff] %vm405_vm0, %v399_v62  ;;  %v1080_v25 = vadd.f32 %v935_v2, %v317_v10  ;;  %v318_v26 = vmul.f32 %v922_v1, %v282_v15  ;;  %v393_v27 = vmax.f32 %v1054_v13, 0.0  ;;  %v1087_v28 = vadd.f32 %v935_v2, %v326_v14 }
  0x1f   : > { %818 = vmatmul.msk.f32.gmra.mxu0 %vm405_vm0, %v374_v50  ;;  %408 = vst.msk [vmem:[%s959_s12 + $0x10] sm:$0xff] %vm405_vm0, %v375_v4  ;;  %v327_v29 = vmul.f32 %v922_v1, %v291_v19  ;;  %v401_v30 = vmax.f32 %v1062_v17, 0.0  ;;  %v1094_v31 = vadd.f32 %v935_v2, %v334_v18  ;;  %v335_v32 = vmul.f32 %v922_v1, %v299_v23 }
  0x20   : > { %826 = vmatmul.msk.f32.gmra.mxu1 %vm405_vm0, %v382_v54  ;;  %416 = vst.msk [vmem:[%s959_s12 + $0x50] sm:$0xff] %vm405_vm0, %v383_v8  ;;  %v377_v35 = vmax.f32 %v1072_v21, 0.0  ;;  %v346_v36 = vadd.f32 %v935_v2, %v310_v22  ;;  %v311_v37 = vmul.f32 %v922_v1, %v275_v33  ;;  %v385_v38 = vmax.f32 %v1080_v25, 0.0 }
  0x21   : > { %425 = vst.msk [vmem:[%s959_s12 + $0x98] sm:$0xff] %vm405_vm0, %v392_v12  ;;  %v354_v39 = vadd.f32 %v935_v2, %v318_v26  ;;  %v319_v40 = vmul.f32 %v922_v1, %v283_v34  ;;  %v394_v43 = vmax.f32 %v1087_v28, 0.0  ;;  %v363_v44 = vadd.f32 %v935_v2, %v327_v29 }
  0x22   : > { %433 = vst.msk [vmem:[%s959_s12 + $0xd8] sm:$0xff] %vm405_vm0, %v400_v16  ;;  %v328_v45 = vmul.f32 %v922_v1, %v292_v41  ;;  %v402_v46 = vmax.f32 %v1094_v31, 0.0  ;;  %v371_v47 = vadd.f32 %v935_v2, %v335_v32  ;;  %v336_v48 = vmul.f32 %v922_v1, %v300_v42 }
  0x23   : > { %409 = vst.msk [vmem:[%s959_s12 + $0x18] sm:$0xff] %vm405_vm0, %v376_v20  ;;  %v378_v49 = vmax.f32 %v346_v36, 0.0  ;;  %v347_v50 = vadd.f32 %v935_v2, %v311_v37  ;;  %v386_v51 = vmax.f32 %v354_v39, 0.0  ;;  %v355_v52 = vadd.f32 %v935_v2, %v319_v40 }
  0x24   : > { %417 = vst.msk [vmem:[%s959_s12 + $0x58] sm:$0xff] %vm405_vm0, %v384_v24  ;;  %v395_v53 = vmax.f32 %v363_v44, 0.0  ;;  %v364_v54 = vadd.f32 %v935_v2, %v328_v45  ;;  %v403_v55 = vmax.f32 %v371_v47, 0.0  ;;  %v372_v56 = vadd.f32 %v935_v2, %v336_v48 }
  0x25   : > { %835 = vmatmul.msk.f32.gmra.mxu2 %vm405_vm0, %v391_v58  ;;  %426 = vst.msk [vmem:[%s959_s12 + $0xa0] sm:$0xff] %vm405_vm0, %v393_v27  ;;  %v284_v58 = vld [vmem:[%s930_s7 + $0x78] sm:$0xff]  ;;  %v379_v60 = vmax.f32 %v347_v50, 0.0  ;;  %v312_v61 = vmul.f32 %v922_v1, %v276_v57  ;;  %v387_v59 = vmax.f32 %v355_v52, 0.0 }
  0x26   : > { %843 = vmatmul.msk.f32.gmra.mxu3 %vm405_vm0, %v399_v62  ;;  %434 = vst.msk [vmem:[%s959_s12 + $0xe0] sm:$0xff] %vm405_vm0, %v401_v30  ;;  %v320_v62 = vmul.f32 %v922_v1, %v284_v58  ;;  %v396_v63 = vmax.f32 %v364_v54, 0.0 }
  0x27   : > { %819 = vmatmul.msk.f32.gmra.mxu0 %vm405_vm0, %v375_v4  ;;  %410 = vst.msk [vmem:[%s959_s12 + $0x20] sm:$0xff] %vm405_vm0, %v377_v35  ;;  %v348_v0 = vadd.f32 %v935_v2, %v312_v61  ;;  %v404_v4 = vmax.f32 %v372_v56, 0.0 }
  0x28   : > { %827 = vmatmul.msk.f32.gmra.mxu1 %vm405_vm0, %v383_v8  ;;  %418 = vst.msk [vmem:[%s959_s12 + $0x60] sm:$0xff] %vm405_vm0, %v385_v38  ;;  %v356_v3 = vadd.f32 %v935_v2, %v320_v62  ;;  %v1192_v2 = vld [vmem:[%s1303_s4] ss:$0 sm:$0xff] }
  0x29   : > { %427 = vst.msk [vmem:[%s959_s12 + $0xa8] sm:$0xff] %vm405_vm0, %v394_v43  ;;  %v380_v1 = vmax.f32 %v348_v0, 0.0 }
  0x2a   : > { %435 = vst.msk [vmem:[%s959_s12 + $0xe8] sm:$0xff] %vm405_vm0, %v402_v46  ;;  %v388_v5 = vmax.f32 %v356_v3, 0.0 }
  0x2b   : > { %411 = vst.msk [vmem:[%s959_s12 + $0x28] sm:$0xff] %vm405_vm0, %v378_v49 }
  0x2c   : > { %419 = vst.msk [vmem:[%s959_s12 + $0x68] sm:$0xff] %vm405_vm0, %v386_v51 }
  0x2d   : > { %836 = vmatmul.msk.f32.gmra.mxu2 %vm405_vm0, %v392_v12  ;;  %428 = vst.msk [vmem:[%s959_s12 + $0xb0] sm:$0xff] %vm405_vm0, %v395_v53 }
  0x2e   : > { %844 = vmatmul.msk.f32.gmra.mxu3 %vm405_vm0, %v400_v16  ;;  %436 = vst.msk [vmem:[%s959_s12 + $0xf0] sm:$0xff] %vm405_vm0, %v403_v55 }
  0x2f   : > { %820 = vmatmul.msk.f32.gmra.mxu0 %vm405_vm0, %v376_v20  ;;  %412 = vst.msk [vmem:[%s959_s12 + $0x30] sm:$0xff] %vm405_vm0, %v379_v60 }
  0x30   : > { %828 = vmatmul.msk.f32.gmra.mxu1 %vm405_vm0, %v384_v24  ;;  %420 = vst.msk [vmem:[%s959_s12 + $0x70] sm:$0xff] %vm405_vm0, %v387_v59 }
  0x31   : > { %429 = vst.msk [vmem:[%s959_s12 + $0xb8] sm:$0xff] %vm405_vm0, %v396_v63 }
  0x32   : > { %437 = vst.msk [vmem:[%s959_s12 + $0xf8] sm:$0xff] %vm405_vm0, %v404_v4 }
  0x33   : > { %413 = vst.msk [vmem:[%s959_s12 + $0x38] sm:$0xff] %vm405_vm0, %v380_v1 }
  0x34   : > { %421 = vst.msk [vmem:[%s959_s12 + $0x78] sm:$0xff] %vm405_vm0, %v388_v5 }
  0x35   : > { %837 = vmatmul.msk.f32.gmra.mxu2 %vm405_vm0, %v393_v27 }
  0x36   : > { %845 = vmatmul.msk.f32.gmra.mxu3 %vm405_vm0, %v401_v30 }
  0x37   : > { %821 = vmatmul.msk.f32.gmra.mxu0 %vm405_vm0, %v377_v35 }
  0x38   : > { %829 = vmatmul.msk.f32.gmra.mxu1 %vm405_vm0, %v385_v38 }
  0x3d   : > { %838 = vmatmul.msk.f32.gmra.mxu2 %vm405_vm0, %v394_v43 }
  0x3e   : > { %846 = vmatmul.msk.f32.gmra.mxu3 %vm405_vm0, %v402_v46 }
  0x3f   : > { %822 = vmatmul.msk.f32.gmra.mxu0 %vm405_vm0, %v378_v49 }
  0x40   : > { %830 = vmatmul.msk.f32.gmra.mxu1 %vm405_vm0, %v386_v51 }
  0x45   : > { %839 = vmatmul.msk.f32.gmra.mxu2 %vm405_vm0, %v395_v53 }
  0x46   : > { %847 = vmatmul.msk.f32.gmra.mxu3 %vm405_vm0, %v403_v55 }
  0x47   : > { %823 = vmatmul.msk.f32.gmra.mxu0 %vm405_vm0, %v379_v60 }
  0x48   : > { %831 = vmatmul.msk.f32.gmra.mxu1 %vm405_vm0, %v387_v59 }
  0x4d   : > { %840 = vmatmul.msk.f32.gmra.mxu2 %vm405_vm0, %v396_v63 }
  0x4e   : > { %848 = vmatmul.msk.f32.gmra.mxu3 %vm405_vm0, %v404_v4 }
  0x4f   : > { %824 = vmatmul.msk.f32.gmra.mxu0 %vm405_vm0, %v380_v1 }
  0x50   : > { %832 = vmatmul.msk.f32.gmra.mxu1 %vm405_vm0, %v388_v5 }
  0x94   : > { %v556_v6 = vpop.f32.mrf.mxu0 }
  0x95   : > { %v580_v7 = vpop.f32.mrf.mxu1  ;;  %v557_v8 = vadd.f32 %v1192_v2, %v556_v6 }
  0x96   : > { %v581_v9 = vadd.f32 %v1192_v2, %v580_v7 }
  0x97   : > { %v652_v10 = vmax.f32 %v557_v8, 0.0 }
  0x98   : > { %v660_v11 = vmax.f32 %v581_v9, 0.0  ;;  %v604_v12 = vpop.f32.mrf.mxu2 }
  0x99   : > { %684 = vst.msk [vmem:[%s1200_s17] sm:$0xff] %vm405_vm0, %v652_v10  ;;  %v628_v13 = vpop.f32.mrf.mxu3  ;;  %v605_v14 = vadd.f32 %v1192_v2, %v604_v12 }
  0x9a   : > { %692 = vst.msk [vmem:[%s1200_s17 + $0x40] sm:$0xff] %vm405_vm0, %v660_v11  ;;  %v629_v15 = vadd.f32 %v1192_v2, %v628_v13 }
  0x9b   : > { %v668_v16 = vmax.f32 %v605_v14, 0.0 }
  0x9c   : > { %v676_v17 = vmax.f32 %v629_v15, 0.0  ;;  %v559_v18 = vpop.f32.mrf.mxu0 }
  0x9d   : > { %v583_v19 = vpop.f32.mrf.mxu1  ;;  %v560_v20 = vadd.f32 %v1192_v2, %v559_v18  ;;  %700 = vst.msk [vmem:[%s1200_s17 + $0x80] sm:$0xff] %vm405_vm0, %v668_v16 }
  0x9e   : > { %v584_v21 = vadd.f32 %v1192_v2, %v583_v19  ;;  %708 = vst.msk [vmem:[%s1200_s17 + $0xc0] sm:$0xff] %vm405_vm0, %v676_v17 }
  0x9f   : > { %v653_v22 = vmax.f32 %v560_v20, 0.0 }
  0xa0   : > { %v661_v23 = vmax.f32 %v584_v21, 0.0  ;;  %v607_v24 = vpop.f32.mrf.mxu2 }
  0xa1   : > { %685 = vst.msk [vmem:[%s1200_s17 + $0x8] sm:$0xff] %vm405_vm0, %v653_v22  ;;  %v631_v25 = vpop.f32.mrf.mxu3  ;;  %v608_v26 = vadd.f32 %v1192_v2, %v607_v24 }
  0xa2   : > { %693 = vst.msk [vmem:[%s1200_s17 + $0x48] sm:$0xff] %vm405_vm0, %v661_v23  ;;  %v632_v27 = vadd.f32 %v1192_v2, %v631_v25 }
  0xa3   : > { %v669_v28 = vmax.f32 %v608_v26, 0.0 }
  0xa4   : > { %v677_v29 = vmax.f32 %v632_v27, 0.0  ;;  %v562_v30 = vpop.f32.mrf.mxu0 }
  0xa5   : > { %v586_v31 = vpop.f32.mrf.mxu1  ;;  %v563_v32 = vadd.f32 %v1192_v2, %v562_v30  ;;  %701 = vst.msk [vmem:[%s1200_s17 + $0x88] sm:$0xff] %vm405_vm0, %v669_v28 }
  0xa6   : > { %v587_v33 = vadd.f32 %v1192_v2, %v586_v31  ;;  %709 = vst.msk [vmem:[%s1200_s17 + $0xc8] sm:$0xff] %vm405_vm0, %v677_v29 }
  0xa7   : > { %v654_v34 = vmax.f32 %v563_v32, 0.0 }
  0xa8   : > { %v662_v35 = vmax.f32 %v587_v33, 0.0  ;;  %v610_v36 = vpop.f32.mrf.mxu2 }
  0xa9   : > { %686 = vst.msk [vmem:[%s1200_s17 + $0x10] sm:$0xff] %vm405_vm0, %v654_v34  ;;  %v634_v37 = vpop.f32.mrf.mxu3  ;;  %v611_v38 = vadd.f32 %v1192_v2, %v610_v36 }
  0xaa   : > { %694 = vst.msk [vmem:[%s1200_s17 + $0x50] sm:$0xff] %vm405_vm0, %v662_v35  ;;  %v635_v39 = vadd.f32 %v1192_v2, %v634_v37 }
  0xab   : > { %v670_v40 = vmax.f32 %v611_v38, 0.0 }
  0xac   : > { %v678_v41 = vmax.f32 %v635_v39, 0.0  ;;  %v565_v42 = vpop.f32.mrf.mxu0 }
  0xad   : > { %v589_v43 = vpop.f32.mrf.mxu1  ;;  %v566_v44 = vadd.f32 %v1192_v2, %v565_v42  ;;  %702 = vst.msk [vmem:[%s1200_s17 + $0x90] sm:$0xff] %vm405_vm0, %v670_v40 }
  0xae   : > { %v590_v45 = vadd.f32 %v1192_v2, %v589_v43  ;;  %710 = vst.msk [vmem:[%s1200_s17 + $0xd0] sm:$0xff] %vm405_vm0, %v678_v41 }
  0xaf   : > { %v655_v46 = vmax.f32 %v566_v44, 0.0 }
  0xb0   : > { %v663_v47 = vmax.f32 %v590_v45, 0.0  ;;  %v613_v48 = vpop.f32.mrf.mxu2 }
  0xb1   : > { %687 = vst.msk [vmem:[%s1200_s17 + $0x18] sm:$0xff] %vm405_vm0, %v655_v46  ;;  %v637_v49 = vpop.f32.mrf.mxu3  ;;  %v614_v50 = vadd.f32 %v1192_v2, %v613_v48 }
  0xb2   : > { %695 = vst.msk [vmem:[%s1200_s17 + $0x58] sm:$0xff] %vm405_vm0, %v663_v47  ;;  %v638_v51 = vadd.f32 %v1192_v2, %v637_v49 }
  0xb3   : > { %v671_v52 = vmax.f32 %v614_v50, 0.0 }
  0xb4   : > { %v679_v53 = vmax.f32 %v638_v51, 0.0  ;;  %v568_v54 = vpop.f32.mrf.mxu0 }
  0xb5   : > { %v592_v55 = vpop.f32.mrf.mxu1  ;;  %v569_v56 = vadd.f32 %v1192_v2, %v568_v54  ;;  %703 = vst.msk [vmem:[%s1200_s17 + $0x98] sm:$0xff] %vm405_vm0, %v671_v52 }
  0xb6   : > { %v593_v57 = vadd.f32 %v1192_v2, %v592_v55  ;;  %711 = vst.msk [vmem:[%s1200_s17 + $0xd8] sm:$0xff] %vm405_vm0, %v679_v53 }
  0xb7   : > { %v656_v58 = vmax.f32 %v569_v56, 0.0 }
  0xb8   : > { %v664_v60 = vmax.f32 %v593_v57, 0.0  ;;  %v616_v61 = vpop.f32.mrf.mxu2 }
  0xb9   : > { %688 = vst.msk [vmem:[%s1200_s17 + $0x20] sm:$0xff] %vm405_vm0, %v656_v58  ;;  %v640_v62 = vpop.f32.mrf.mxu3  ;;  %v617_v59 = vadd.f32 %v1192_v2, %v616_v61 }
  0xba   : > { %696 = vst.msk [vmem:[%s1200_s17 + $0x60] sm:$0xff] %vm405_vm0, %v664_v60  ;;  %v641_v63 = vadd.f32 %v1192_v2, %v640_v62 }
  0xbb   : > { %v672_v0 = vmax.f32 %v617_v59, 0.0 }
  0xbc   : > { %v680_v3 = vmax.f32 %v641_v63, 0.0  ;;  %v571_v4 = vpop.f32.mrf.mxu0 }
  0xbd   : > { %v595_v1 = vpop.f32.mrf.mxu1  ;;  %v572_v5 = vadd.f32 %v1192_v2, %v571_v4  ;;  %704 = vst.msk [vmem:[%s1200_s17 + $0xa0] sm:$0xff] %vm405_vm0, %v672_v0 }
  0xbe   : > { %v596_v6 = vadd.f32 %v1192_v2, %v595_v1  ;;  %712 = vst.msk [vmem:[%s1200_s17 + $0xe0] sm:$0xff] %vm405_vm0, %v680_v3 }
  0xbf   : > { %v657_v7 = vmax.f32 %v572_v5, 0.0 }
  0xc0   : > { %v665_v8 = vmax.f32 %v596_v6, 0.0  ;;  %v619_v9 = vpop.f32.mrf.mxu2 }
  0xc1   : > { %689 = vst.msk [vmem:[%s1200_s17 + $0x28] sm:$0xff] %vm405_vm0, %v657_v7  ;;  %v643_v10 = vpop.f32.mrf.mxu3  ;;  %v620_v11 = vadd.f32 %v1192_v2, %v619_v9 }
  0xc2   : > { %697 = vst.msk [vmem:[%s1200_s17 + $0x68] sm:$0xff] %vm405_vm0, %v665_v8  ;;  %v644_v12 = vadd.f32 %v1192_v2, %v643_v10 }
  0xc3   : > { %v673_v13 = vmax.f32 %v620_v11, 0.0 }
  0xc4   : > { %v681_v14 = vmax.f32 %v644_v12, 0.0  ;;  %v574_v15 = vpop.f32.mrf.mxu0 }
  0xc5   : > { %v598_v16 = vpop.f32.mrf.mxu1  ;;  %v575_v17 = vadd.f32 %v1192_v2, %v574_v15  ;;  %705 = vst.msk [vmem:[%s1200_s17 + $0xa8] sm:$0xff] %vm405_vm0, %v673_v13 }
  0xc6   : > { %v599_v18 = vadd.f32 %v1192_v2, %v598_v16  ;;  %713 = vst.msk [vmem:[%s1200_s17 + $0xe8] sm:$0xff] %vm405_vm0, %v681_v14 }
  0xc7   : > { %v658_v19 = vmax.f32 %v575_v17, 0.0 }
  0xc8   : > { %v666_v20 = vmax.f32 %v599_v18, 0.0  ;;  %v622_v21 = vpop.f32.mrf.mxu2 }
  0xc9   : > { %690 = vst.msk [vmem:[%s1200_s17 + $0x30] sm:$0xff] %vm405_vm0, %v658_v19  ;;  %v646_v22 = vpop.f32.mrf.mxu3  ;;  %v623_v23 = vadd.f32 %v1192_v2, %v622_v21 }
  0xca   : > { %698 = vst.msk [vmem:[%s1200_s17 + $0x70] sm:$0xff] %vm405_vm0, %v666_v20  ;;  %v647_v24 = vadd.f32 %v1192_v2, %v646_v22 }
  0xcb   : > { %v674_v25 = vmax.f32 %v623_v23, 0.0 }
  0xcc   : > { %v682_v26 = vmax.f32 %v647_v24, 0.0  ;;  %v577_v27 = vpop.f32.mrf.mxu0 }
  0xcd   : > { %v601_v28 = vpop.f32.mrf.mxu1  ;;  %v578_v29 = vadd.f32 %v1192_v2, %v577_v27  ;;  %706 = vst.msk [vmem:[%s1200_s17 + $0xb0] sm:$0xff] %vm405_vm0, %v674_v25 }
  0xce   : > { %v602_v30 = vadd.f32 %v1192_v2, %v601_v28  ;;  %714 = vst.msk [vmem:[%s1200_s17 + $0xf0] sm:$0xff] %vm405_vm0, %v682_v26 }
  0xcf   : > { %v659_v31 = vmax.f32 %v578_v29, 0.0 }
  0xd0   : > { %v667_v32 = vmax.f32 %v602_v30, 0.0  ;;  %v625_v33 = vpop.f32.mrf.mxu2 }
  0xd1   : > { %691 = vst.msk [vmem:[%s1200_s17 + $0x38] sm:$0xff] %vm405_vm0, %v659_v31  ;;  %v649_v34 = vpop.f32.mrf.mxu3  ;;  %v626_v35 = vadd.f32 %v1192_v2, %v625_v33 }
  0xd2   : > { %699 = vst.msk [vmem:[%s1200_s17 + $0x78] sm:$0xff] %vm405_vm0, %v667_v32  ;;  %v650_v36 = vadd.f32 %v1192_v2, %v649_v34 }
  0xd3   : > { %v675_v37 = vmax.f32 %v626_v35, 0.0 }
  0xd4   : > { %v683_v38 = vmax.f32 %v650_v36, 0.0 }
  0xd5   : > { %707 = vst.msk [vmem:[%s1200_s17 + $0xb8] sm:$0xff] %vm405_vm0, %v675_v37 }
  0xd6   : > { %715 = vst.msk [vmem:[%s1200_s17 + $0xf8] sm:$0xff] %vm405_vm0, %v683_v38 }
  0xd7 PF: > { %s17_s21 = sadd.s32 1, %s871_s21  }
  0xd8   : > { %p14_p4 = scmp.ge.s32.totalorder %s17_s21, 4  }
  0xda   :  { %16 = sbr.rel (!%p14_p4) target bundleno = 1 (0x1), region = 82 }

// kernel: bottleneck_forward.3
= control target key start
LH: loop header
LB: loop body
LE: loop exit
PB: predicated region body
PF: predicated region fallthrough
CT: control target
= control target key end

     0   :  { %s813_s0 = inlined_call_operand.vmem [shape: f32[128,72], index: 0, kind: input, shape index: {}]   ;;  %s814_s1 = inlined_call_operand.vmem [shape: f32[72,8], index: 1, kind: input, shape index: {}]   ;;  %s815_s2 = inlined_call_operand.vmem [shape: f32[1,8], index: 2, kind: input, shape index: {}]   ;;  %s816_s3 = inlined_call_operand.vmem [shape: f32[8,32], index: 3, kind: input, shape index: {}]   ;;  %s817_s4 = inlined_call_operand.vmem [shape: f32[128,8], index: 4, kind: input, shape index: {}]   ;;  %s818_s5 = inlined_call_operand.vmem [shape: f32[8,32], index: 5, kind: input, shape index: {}]   ;;  %s819_s6 = inlined_call_operand.hbm [shape: f32[128,32], index: 6, kind: output, shape index: {}]  }
   0x1   :  { %v48_v0 = vld [vmem:[%s814_s1 + $0x40] sm:$0xff]  ;;  %v47_v1 = vld [vmem:[%s814_s1 + $0x38] sm:$0xff]  ;;  %v46_v2 = vld [vmem:[%s814_s1 + $0x30] sm:$0xff] }
   0x2   :  { %109 = vmatpush.msra.mxu0 %v48_v0  ;;  %511 = vmatpush.msra.mxu3 %v48_v0  ;;  %v45_v3 = vld [vmem:[%s814_s1 + $0x28] sm:$0xff] }
   0x4   :  { %110 = vmatpush.msra.mxu0 %v47_v1  ;;  %512 = vmatpush.msra.mxu3 %v47_v1 }
   0x5   :  { %11 = vsyncpa [#allocation3], 0  ;;  %v44_v4 = vld [vmem:[%s814_s1 + $0x20] sm:$0xff]  ;;  %v43_v5 = vld [vmem:[%s814_s1 + $0x18] sm:$0xff]  ;;  %vm53_vm0 = vcmask 588800   ;;  %vm201_vm1 = vcmask 64512  }
   0x6   :  { %111 = vmatpush.msra.mxu0 %v46_v2  ;;  %513 = vmatpush.msra.mxu3 %v46_v2  ;;  %v42_v6 = vld [vmem:[%s814_s1 + $0x10] sm:$0xff]  ;;  %v41_v7 = vld [vmem:[%s814_s1 + $0x8] sm:$0xff]  ;;  %v40_v8 = vld [vmem:[%s814_s1] sm:$0xff]  ;;  %vm428_vm2 = vcmask 261120   ;;  %s451_s30 = sshll.u32 %s819_s6, 4  ;;  %s553_s7 = smov 128   ;;  %s452_s30 = int_to_ptr.hbm [resolvable:$true] %s451_s30 }
   0x7   :  { %v24_v9 = vld [vmem:[%s813_s0] sm:$0xff]  ;;  %v35_v10 = vld [vmem:[%s813_s0 + $0x58] sm:$0xff]  ;;  %v25_v11 = vld [vmem:[%s813_s0 + $0x8] sm:$0xff]  ;;  %s554_s8 = smov 8  }
   0x8   :  { %112 = vmatpush.msra.mxu0 %v45_v3  ;;  %514 = vmatpush.msra.mxu3 %v45_v3  ;;  %v36_v12 = vld [vmem:[%s813_s0 + $0x60] sm:$0xff]  ;;  %v26_v13 = vld [vmem:[%s813_s0 + $0x10] sm:$0xff]  ;;  %v37_v14 = vld [vmem:[%s813_s0 + $0x68] sm:$0xff] }
   0x9   :  { %v27_v15 = vld [vmem:[%s813_s0 + $0x18] sm:$0xff]  ;;  %v38_v16 = vld [vmem:[%s813_s0 + $0x70] sm:$0xff]  ;;  %v28_v17 = vld [vmem:[%s813_s0 + $0x20] sm:$0xff] }
   0xa   :  { %113 = vmatpush.msra.mxu0 %v44_v4  ;;  %515 = vmatpush.msra.mxu3 %v44_v4  ;;  %v39_v18 = vld [vmem:[%s813_s0 + $0x78] sm:$0xff]  ;;  %v29_v19 = vld [vmem:[%s813_s0 + $0x28] sm:$0xff]  ;;  %v30_v20 = vld [vmem:[%s813_s0 + $0x30] sm:$0xff] }
   0xb   :  { %v31_v21 = vld [vmem:[%s813_s0 + $0x38] sm:$0xff]  ;;  %v32_v22 = vld [vmem:[%s813_s0 + $0x40] sm:$0xff]  ;;  %v33_v23 = vld [vmem:[%s813_s0 + $0x48] sm:$0xff] }
   0xc   :  { %114 = vmatpush.msra.mxu0 %v43_v5  ;;  %516 = vmatpush.msra.mxu3 %v43_v5  ;;  %v34_v24 = vld [vmem:[%s813_s0 + $0x50] sm:$0xff]  ;;  %v183_v25 = vld [vmem:[%s816_s3] sm:$0xff]  ;;  %v185_v28 = vld [vmem:[%s817_s4 + $0x8] sm:$0xff] }
   0xd   :  { %378 = vmatpush.msra.mxu2 %v183_v25  ;;  %v200_v26 = vld [vmem:[%s818_s5] sm:$0xff]  ;;  %v186_v29 = vld [vmem:[%s817_s4 + $0x10] sm:$0xff]  ;;  %v187_v33 = vld [vmem:[%s817_s4 + $0x18] sm:$0xff] }
   0xe   :  { %115 = vmatpush.msra.mxu0 %v42_v6  ;;  %517 = vmatpush.msra.mxu3 %v42_v6  ;;  %v184_v27 = vld [vmem:[%s817_s4] sm:$0xff]  ;;  %v197_v35 = vld [vmem:[%s817_s4 + $0x68] sm:$0xff]  ;;  %v198_v41 = vld [vmem:[%s817_s4 + $0x70] sm:$0xff] }
   0xf   :  { %265 = vmatpush.msra.mxu1 %v200_v26  ;;  %v702_v30 = vld [vmem:[%s815_s2] ss:$0 sm:$0xff]  ;;  %v189_v45 = vld [vmem:[%s817_s4 + $0x28] sm:$0xff]  ;;  %v199_v47 = vld [vmem:[%s817_s4 + $0x78] sm:$0xff] }
  0x10   :  { %116 = vmatpush.msra.mxu0 %v41_v7  ;;  %518 = vmatpush.msra.mxu3 %v41_v7  ;;  %v188_v39 = vld [vmem:[%s817_s4 + $0x20] sm:$0xff]  ;;  %v190_v52 = vld [vmem:[%s817_s4 + $0x30] sm:$0xff]  ;;  %v191_v59 = vld [vmem:[%s817_s4 + $0x38] sm:$0xff] }
  0x11   :  { %479 = vmatmul.msk.f32.vlgmr.msra.gmra.mxu1 %vm201_vm1, %v184_v27  ;;  %v192_v2 = vld [vmem:[%s817_s4 + $0x40] sm:$0xff]  ;;  %v193_v7 = vld [vmem:[%s817_s4 + $0x48] sm:$0xff] }
  0x12   :  { %117 = vmatpush.msra.mxu0 %v40_v8  ;;  %519 = vmatpush.msra.mxu3 %v40_v8 }
  0x13   :  { %463 = vmatmul.msk.f32.vlgmr.msra.gmra.mxu0 %vm53_vm0, %v24_v9  ;;  %474 = vmatmul.msk.f32.vlgmr.msra.gmra.mxu3 %vm53_vm0, %v35_v10  ;;  %v194_v10 = vld [vmem:[%s817_s4 + $0x50] sm:$0xff] }
  0x14   :  { %520 = vmatpush.msrb.mxu3 %v200_v26 }
  0x16   :  { %521 = vmatpush.msra.mxu3 %v183_v25 }
  0x19   :  { %480 = vmatmul.msk.f32.gmra.mxu1 %vm201_vm1, %v185_v28 }
  0x1b   :  { %464 = vmatmul.msk.f32.gmra.mxu0 %vm53_vm0, %v25_v11  ;;  %475 = vmatmul.msk.f32.gmra.mxu3 %vm53_vm0, %v36_v12 }
  0x21   :  { %481 = vmatmul.msk.f32.gmra.mxu1 %vm201_vm1, %v186_v29 }
  0x23   :  { %465 = vmatmul.msk.f32.gmra.mxu0 %vm53_vm0, %v26_v13  ;;  %476 = vmatmul.msk.f32.gmra.mxu3 %vm53_vm0, %v37_v14  ;;  %v195_v14 = vld [vmem:[%s817_s4 + $0x58] sm:$0xff] }
  0x29   :  { %482 = vmatmul.msk.f32.gmra.mxu1 %vm201_vm1, %v187_v33 }
  0x2b   :  { %466 = vmatmul.msk.f32.gmra.mxu0 %vm53_vm0, %v27_v15  ;;  %477 = vmatmul.msk.f32.gmra.mxu3 %vm53_vm0, %v38_v16 }
  0x31   :  { %483 = vmatmul.msk.f32.gmra.mxu1 %vm201_vm1, %v188_v39 }
  0x33   :  { %467 = vmatmul.msk.f32.gmra.mxu0 %vm53_vm0, %v28_v17  ;;  %478 = vmatmul.msk.f32.gmra.mxu3 %vm53_vm0, %v39_v18  ;;  %v196_v18 = vld [vmem:[%s817_s4 + $0x60] sm:$0xff]  ;;  %s552_s4 = smov [#allocation2]  }
  0x34   :  { %s449_s28 = sshll.u32 %s552_s4, 4  ;;  %s450_s28 = int_to_ptr.vmem [resolvable:$true] %s449_s28 }
  0x39   :  { %484 = vmatmul.msk.f32.gmra.mxu1 %vm201_vm1, %v189_v45 }
  0x3b   :  { %468 = vmatmul.msk.f32.gmra.mxu0 %vm53_vm0, %v29_v19  ;;  %492 = vmatmul.msk.f32.vlgmr.msrb.gmra.mxu3 %vm201_vm1, %v197_v35 }
  0x41   :  { %485 = vmatmul.msk.f32.gmra.mxu1 %vm201_vm1, %v190_v52 }
  0x43   :  { %469 = vmatmul.msk.f32.gmra.mxu0 %vm53_vm0, %v30_v20  ;;  %493 = vmatmul.msk.f32.gmra.mxu3 %vm201_vm1, %v198_v41 }
  0x49   :  { %486 = vmatmul.msk.f32.gmra.mxu1 %vm201_vm1, %v191_v59 }
  0x4b   :  { %470 = vmatmul.msk.f32.gmra.mxu0 %vm53_vm0, %v31_v21  ;;  %494 = vmatmul.msk.f32.gmra.mxu3 %vm201_vm1, %v199_v47 }
  0x51   :  { %487 = vmatmul.msk.f32.gmra.mxu1 %vm201_vm1, %v192_v2 }
  0x53   :  { %471 = vmatmul.msk.f32.gmra.mxu0 %vm53_vm0, %v32_v22 }
  0x59   :  { %488 = vmatmul.msk.f32.gmra.mxu1 %vm201_vm1, %v193_v7 }
  0x5b   :  { %472 = vmatmul.msk.f32.gmra.mxu0 %vm53_vm0, %v33_v23 }
  0x61   :  { %489 = vmatmul.msk.f32.gmra.mxu1 %vm201_vm1, %v194_v10 }
  0x63   :  { %473 = vmatmul.msk.f32.gmra.mxu0 %vm53_vm0, %v34_v24 }
  0x69   :  { %490 = vmatmul.msk.f32.gmra.mxu1 %vm201_vm1, %v195_v14 }
  0x71   :  { %491 = vmatmul.msk.f32.gmra.mxu1 %vm201_vm1, %v196_v18 }
  0x8e   :  { %v267_v28 = vpop.f32.mrf.mxu1 }
  0x90   :  { %v119_v31 = vpop.f32.mrf.mxu0 }
  0x91   :  { %v120_v32 = vadd.f32 %v702_v30, %v119_v31 }
  0x93   :  { %v167_v34 = vmax.f32 %v120_v32, 0.0 }
  0x95   :  { %495 = vmatmul.msk.f32.vlgmr.msra.gmra.mxu2 %vm201_vm1, %v167_v34 }
  0x96   :  { %v714_v37 = vpop.f32.mrf.mxu3  ;;  %v270_v29 = vpop.f32.mrf.mxu1 }
  0x97   :  { %v153_v24 = vadd.f32 %v702_v30, %v714_v37 }
  0x98   :  { %v122_v36 = vpop.f32.mrf.mxu0 }
  0x99   :  { %v123_v38 = vadd.f32 %v702_v30, %v122_v36  ;;  %v178_v25 = vmax.f32 %v153_v24, 0.0 }
  0x9b   :  { %v168_v40 = vmax.f32 %v123_v38, 0.0 }
  0x9d   :  { %496 = vmatmul.msk.f32.gmra.mxu2 %vm201_vm1, %v168_v40 }
  0x9e   :  { %v726_v43 = vpop.f32.mrf.mxu3  ;;  %v273_v31 = vpop.f32.mrf.mxu1 }
  0x9f   :  { %v156_v26 = vadd.f32 %v702_v30, %v726_v43 }
  0xa0   :  { %v125_v42 = vpop.f32.mrf.mxu0 }
  0xa1   :  { %v126_v44 = vadd.f32 %v702_v30, %v125_v42  ;;  %v179_v27 = vmax.f32 %v156_v26, 0.0 }
  0xa3   :  { %v169_v46 = vmax.f32 %v126_v44, 0.0 }
  0xa5   :  { %497 = vmatmul.msk.f32.gmra.mxu2 %vm201_vm1, %v169_v46 }
  0xa6   :  { %v158_v49 = vpop.f32.mrf.mxu3  ;;  %v276_v35 = vpop.f32.mrf.mxu1 }
  0xa7   :  { %v159_v51 = vadd.f32 %v702_v30, %v158_v49 }
  0xa8   :  { %v128_v48 = vpop.f32.mrf.mxu0 }
  0xa9   :  { %v129_v50 = vadd.f32 %v702_v30, %v128_v48  ;;  %v180_v54 = vmax.f32 %v159_v51, 0.0 }
  0xab   :  { %v170_v53 = vmax.f32 %v129_v50, 0.0  ;;  %508 = vmatmul.msk.f32.vlgmr.msra.gmra.mxu3 %vm201_vm1, %v180_v54 }
  0xad   :  { %498 = vmatmul.msk.f32.gmra.mxu2 %vm201_vm1, %v170_v53 }
  0xae   :  { %v161_v56 = vpop.f32.mrf.mxu3  ;;  %v279_v39 = vpop.f32.mrf.mxu1 }
  0xaf   :  { %v162_v58 = vadd.f32 %v702_v30, %v161_v56 }
  0xb0   :  { %v131_v55 = vpop.f32.mrf.mxu0 }
  0xb1   :  { %v132_v57 = vadd.f32 %v702_v30, %v131_v55  ;;  %v181_v61 = vmax.f32 %v162_v58, 0.0 }
  0xb3   :  { %v171_v60 = vmax.f32 %v132_v57, 0.0  ;;  %509 = vmatmul.msk.f32.gmra.mxu3 %vm201_vm1, %v181_v61 }
  0xb5   :  { %499 = vmatmul.msk.f32.gmra.mxu2 %vm201_vm1, %v171_v60 }
  0xb6   :  { %v164_v63 = vpop.f32.mrf.mxu3  ;;  %v282_v43 = vpop.f32.mrf.mxu1 }
  0xb7   :  { %v165_v1 = vadd.f32 %v702_v30, %v164_v63 }
  0xb8   :  { %v134_v62 = vpop.f32.mrf.mxu0 }
  0xb9   :  { %v135_v0 = vadd.f32 %v702_v30, %v134_v62  ;;  %v182_v4 = vmax.f32 %v165_v1, 0.0 }
  0xbb   :  { %v172_v3 = vmax.f32 %v135_v0, 0.0  ;;  %510 = vmatmul.msk.f32.gmra.mxu3 %vm201_vm1, %v182_v4 }
  0xbd   :  { %500 = vmatmul.msk.f32.gmra.mxu2 %vm201_vm1, %v172_v3 }
  0xbe   :  { %v306_v32 = vpop.f32.mrf.mxu3  ;;  %v285_v50 = vpop.f32.mrf.mxu1 }
  0xc0   :  { %v137_v5 = vpop.f32.mrf.mxu0 }
  0xc1   :  { %v138_v6 = vadd.f32 %v702_v30, %v137_v5 }
  0xc3   :  { %v173_v8 = vmax.f32 %v138_v6, 0.0 }
  0xc5   :  { %501 = vmatmul.msk.f32.gmra.mxu2 %vm201_vm1, %v173_v8 }
  0xc6   :  { %v309_v36 = vpop.f32.mrf.mxu3  ;;  %v288_v56 = vpop.f32.mrf.mxu1 }
  0xc8   :  { %v140_v9 = vpop.f32.mrf.mxu0 }
  0xc9   :  { %v141_v11 = vadd.f32 %v702_v30, %v140_v9 }
  0xcb   :  { %v174_v12 = vmax.f32 %v141_v11, 0.0 }
  0xcd   :  { %502 = vmatmul.msk.f32.gmra.mxu2 %vm201_vm1, %v174_v12 }
  0xce   :  { %v291_v59 = vpop.f32.mrf.mxu1 }
  0xd0   :  { %v143_v13 = vpop.f32.mrf.mxu0 }
  0xd1   :  { %v144_v15 = vadd.f32 %v702_v30, %v143_v13 }
  0xd3   :  { %v175_v16 = vmax.f32 %v144_v15, 0.0 }
  0xd5   :  { %503 = vmatmul.msk.f32.gmra.mxu2 %vm201_vm1, %v175_v16 }
  0xd6   :  { %v294_v63 = vpop.f32.mrf.mxu1 }
  0xd8   :  { %v146_v17 = vpop.f32.mrf.mxu0 }
  0xd9   :  { %v147_v19 = vadd.f32 %v702_v30, %v146_v17 }
  0xdb   :  { %v176_v20 = vmax.f32 %v147_v19, 0.0 }
  0xdd   :  { %504 = vmatmul.msk.f32.gmra.mxu2 %vm201_vm1, %v176_v20 }
  0xde   :  { %v297_v3 = vpop.f32.mrf.mxu1 }
  0xe0   :  { %v149_v21 = vpop.f32.mrf.mxu0 }
  0xe1   :  { %v150_v22 = vadd.f32 %v702_v30, %v149_v21  ;;  %v312_v30 = vpop.f32.mrf.mxu3 }
  0xe3   :  { %v177_v23 = vmax.f32 %v150_v22, 0.0 }
  0xe5   :  { %505 = vmatmul.msk.f32.gmra.mxu2 %vm201_vm1, %v177_v23 }
  0xe6   :  { %v300_v6 = vpop.f32.mrf.mxu1 }
  0xed   :  { %506 = vmatmul.msk.f32.gmra.mxu2 %vm201_vm1, %v178_v25 }
  0xee   :  { %v303_v9 = vpop.f32.mrf.mxu1 }
  0xf5   :  { %507 = vmatmul.msk.f32.gmra.mxu2 %vm201_vm1, %v179_v27 }
 0x118   :  { %v380_v33 = vpop.f32.mrf.mxu2 }
 0x119   :  { %v381_v34 = vadd.f32 %v380_v33, %v267_v28 }
 0x11b   :  { %429 = vst.msk [vmem:[#allocation2] sm:$0xff] %vm428_vm2, %v381_v34 }
 0x120   :  { %v383_v37 = vpop.f32.mrf.mxu2 }
 0x121   :  { %v384_v38 = vadd.f32 %v383_v37, %v270_v29 }
 0x123   :  { %430 = vst.msk [vmem:[#allocation2 + $0x8] sm:$0xff] %vm428_vm2, %v384_v38 }
 0x128   :  { %v386_v40 = vpop.f32.mrf.mxu2 }
 0x129   :  { %v387_v41 = vadd.f32 %v386_v40, %v273_v31 }
 0x12b   :  { %431 = vst.msk [vmem:[#allocation2 + $0x10] sm:$0xff] %vm428_vm2, %v387_v41 }
 0x12e   :  { %v419_v45 = vpop.f32.mrf.mxu3 }
 0x12f   :  { %v420_v46 = vadd.f32 %v419_v45, %v306_v32 }
 0x130   :  { %v389_v42 = vpop.f32.mrf.mxu2 }
 0x131   :  { %v390_v44 = vadd.f32 %v389_v42, %v276_v35  ;;  %442 = vst.msk [vmem:[#allocation2 + $0x68] sm:$0xff] %vm428_vm2, %v420_v46 }
 0x133   :  { %432 = vst.msk [vmem:[#allocation2 + $0x18] sm:$0xff] %vm428_vm2, %v390_v44 }
 0x136   :  { %v422_v49 = vpop.f32.mrf.mxu3 }
 0x137   :  { %v423_v51 = vadd.f32 %v422_v49, %v309_v36 }
 0x138   :  { %v392_v47 = vpop.f32.mrf.mxu2 }
 0x139   :  { %v393_v48 = vadd.f32 %v392_v47, %v279_v39  ;;  %443 = vst.msk [vmem:[#allocation2 + $0x70] sm:$0xff] %vm428_vm2, %v423_v51 }
 0x13b   :  { %433 = vst.msk [vmem:[#allocation2 + $0x20] sm:$0xff] %vm428_vm2, %v393_v48 }
 0x13e   :  { %v425_v54 = vpop.f32.mrf.mxu3 }
 0x13f   :  { %v426_v55 = vadd.f32 %v425_v54, %v312_v30 }
 0x140   :  { %v395_v52 = vpop.f32.mrf.mxu2 }
 0x141   :  { %v396_v53 = vadd.f32 %v395_v52, %v282_v43  ;;  %444 = vst.msk [vmem:[#allocation2 + $0x78] sm:$0xff] %vm428_vm2, %v426_v55 }
 0x143   :  { %434 = vst.msk [vmem:[#allocation2 + $0x28] sm:$0xff] %vm428_vm2, %v396_v53 }
 0x148   :  { %v398_v57 = vpop.f32.mrf.mxu2 }
 0x149   :  { %v399_v58 = vadd.f32 %v398_v57, %v285_v50 }
 0x14b   :  { %435 = vst.msk [vmem:[#allocation2 + $0x30] sm:$0xff] %vm428_vm2, %v399_v58 }
 0x150   :  { %v401_v60 = vpop.f32.mrf.mxu2 }
 0x151   :  { %v402_v61 = vadd.f32 %v401_v60, %v288_v56 }
 0x153   :  { %436 = vst.msk [vmem:[#allocation2 + $0x38] sm:$0xff] %vm428_vm2, %v402_v61 }
 0x158   :  { %v404_v62 = vpop.f32.mrf.mxu2 }
 0x159   :  { %v405_v0 = vadd.f32 %v404_v62, %v291_v59 }
 0x15b   :  { %437 = vst.msk [vmem:[#allocation2 + $0x40] sm:$0xff] %vm428_vm2, %v405_v0 }
 0x160   :  { %v407_v1 = vpop.f32.mrf.mxu2 }
 0x161   :  { %v408_v2 = vadd.f32 %v407_v1, %v294_v63 }
 0x163   :  { %438 = vst.msk [vmem:[#allocation2 + $0x48] sm:$0xff] %vm428_vm2, %v408_v2 }
 0x168   :  { %v410_v4 = vpop.f32.mrf.mxu2 }
 0x169   :  { %v411_v5 = vadd.f32 %v410_v4, %v297_v3 }
 0x16b   :  { %439 = vst.msk [vmem:[#allocation2 + $0x50] sm:$0xff] %vm428_vm2, %v411_v5 }
 0x170   :  { %v413_v7 = vpop.f32.mrf.mxu2 }
 0x171   :  { %v414_v8 = vadd.f32 %v413_v7, %v300_v6 }
 0x173   :  { %440 = vst.msk [vmem:[#allocation2 + $0x58] sm:$0xff] %vm428_vm2, %v414_v8 }
 0x178   :  { %v416_v10 = vpop.f32.mrf.mxu2 }
 0x179   :  { %v417_v11 = vadd.f32 %v416_v10, %v303_v9 }
 0x17b   :  { %441 = vst.msk [vmem:[#allocation2 + $0x60] sm:$0xff] %vm428_vm2, %v417_v11 }
 0x17c   :  { %457 = dma.vmem_to_hbm [thread:$0]  %s450_s28, 2048, %s452_s30, [#allocation3], %s553_s7, %s553_s7, %s554_s8  }
 0x17d   :  { %550 = dma.done.wait [#allocation3], 2048  }
 0x17e   :  { %551 = vsyncadd [#allocation3], 4294965248 }
 0x17f   :  { %462 = vsyncpa [#allocation3], 1 }

</bundles_post_ra>
